<compile_context>
chip_gen: v6e
topology: v6e:2x2x1
jax: 0.10.0
libtpu: 0.0.40
codegen_flags: <defaults>
</compile_context>

<pallas_src>
import numpy as np
import jax
import jax.numpy as jnp
from jax.experimental import pallas as pl
from jax.experimental.pallas import tpu as pltpu


def _make_basic_block_kernel(group_taps, compute_dtype):
    """group_taps: 3 dh-groups x 3 static lane-rotation shifts (dw-minor)."""

    def conv3x3(act, w_ref):
        # Split im2col into 3 dh row-groups: each group concatenates only the
        # 3 horizontal taps (K = 3*C) and issues one MXU dot; the three f32
        # partial products are summed.  Avoids the fully materialized
        # (9*C, L) im2col (VMEM hog / vst-slot bound).
        acc = None
        for g, shifts in enumerate(group_taps):
            cols = [act if s == 0 else pltpu.roll(act, shift=s, axis=1)
                    for s in shifts]
            xg = jnp.concatenate(cols, axis=0)                       # (3*C, Lt)
            part = jnp.dot(w_ref[g], xg,                             # (C, Lt) f32
                           preferred_element_type=jnp.float32)
            acc = part if acc is None else acc + part
        return acc

    def kernel(x_ref, w1_ref, b1_ref, w2_ref, b2_ref, m_ref, o_ref):
        inside = m_ref[...] > 0.5                      # (1, Lt) interior lanes
        # conv1 (BN1 scale folded into w1) + bias + ReLU, then re-zero the
        # padded border with a select (jnp.where: no 0*NaN hazard).
        h = conv3x3(x_ref[...].astype(compute_dtype), w1_ref)
        h = jnp.where(inside, jnp.maximum(h + b1_ref[...], 0.0), 0.0)
        # conv2 (BN2 scale folded into w2) + bias + identity + ReLU.
        # x_ref is re-read here at point of use (instead of holding a copy
        # across both convs); border lanes are garbage but are discarded by
        # the wrapper slice.
        h = conv3x3(h.astype(compute_dtype), w2_ref)
        o_ref[...] = jnp.maximum(h + b2_ref[...] + x_ref[...], 0.0)

    return kernel


def basic_block_pallas(x_nchw, w1_oihw, bn1, w2_oihw, bn2, *, eps=1e-5,
                       compute_dtype=jnp.bfloat16, images_per_tile=1):
    """BasicBlock forward (stride=1, no downsample), eval-mode BatchNorm.

    x_nchw: (N, C, H, W) float32 -> (N, C, H, W) float32.
    """
    N, C, H, W = x_nchw.shape
    assert w1_oihw.shape == (C, C, 3, 3) and w2_oihw.shape == (C, C, 3, 3)
    assert N % images_per_tile == 0
    Hp, Wp = H + 2, W + 2
    P = Hp * Wp                                   # padded pixels per image
    Pp = ((P + 127) // 128) * 128                 # per-image lane segment (x128)
    Lt = images_per_tile * Pp                     # lanes per grid step
    T = N // images_per_tile                      # batch tiles = grid steps

    # ---- activations: NCHW -> zero-pad -> lane-dense (T, C, Lt) ----
    # TODO(synk): for stacked BasicBlocks keep activations persistently in this
    #             padded (C, L) layout between blocks; the pad/transpose below
    #             (and the slice/transpose after the call) are extra HBM passes
    #             that only need to happen at network boundaries.
    xpad = jnp.pad(x_nchw.astype(jnp.float32), ((0, 0), (0, 0), (1, 1), (1, 1)))
    xflat = jnp.pad(xpad.reshape(N, C, P), ((0, 0), (0, 0), (0, Pp - P)))
    xt = (xflat.reshape(T, images_per_tile, C, Pp)
                .transpose(0, 2, 1, 3)
                .reshape(T, C, Lt))

    # ---- weights: (Cout, Cin, 3, 3) -> 3 dh-slabs (3, Cout, 3*Cin), with the
    #      BN scale folded in, cast to the MXU compute dtype (bf16 default) ----
    def fold(w, bn):
        g, b, m, v = bn
        s = g / jnp.sqrt(v + eps)
        bias = (b - m * s).reshape(C, 1).astype(jnp.float32)
        ws = w.astype(jnp.float32) * s[:, None, None, None]
        # slabs[dh][co, dw*C + ci] = w[co, ci, dh, dw] * s[co]
        slabs = jnp.transpose(ws, (2, 0, 3, 1)).reshape(3, C, 3 * C)
        return slabs.astype(compute_dtype), bias

    w1t, b1 = fold(w1_oihw, bn1)
    w2t, b2 = fold(w2_oihw, bn2)

    # ---- interior mask over one grid step's lanes (1 inside, 0 border/pad).
    #      Grid-invariant -> DMA'd once and kept resident in VMEM. ----
    interior_img = np.zeros((Hp, Wp), np.float32)
    interior_img[1:H + 1, 1:W + 1] = 1.0
    seg = np.zeros((Pp,), np.float32)
    seg[:P] = interior_img.reshape(-1)
    mask = jnp.asarray(np.tile(seg, images_per_tile).reshape(1, Lt))

    # ---- static lane rotation per 3x3 tap, grouped by dh (dw-minor, matching
    #      the weight slab layout), modulo the per-tile lane length ----
    group_taps = tuple(
        tuple((-((dh - 1) * Wp + (dw - 1))) % Lt for dw in range(3))
        for dh in range(3))

    kernel = _make_basic_block_kernel(group_taps, compute_dtype)

    # ---- VMEM budget: size to the actual per-step working set, clamped to
    #      this chip's capacity (64 MiB/TC on v7x, 128 MiB on v5e/v6e). ----
    cbytes = jnp.dtype(compute_dtype).itemsize
    tile_bytes = (2 * 2 * C * Lt * 4              # x + out tiles, double-buffered (f32)
                  + 2 * 3 * C * 3 * C * cbytes    # folded weight stacks (resident)
                  + 3 * C * Lt * cbytes           # one im2col dh-group (3*C, Lt)
                  + 3 * C * Lt * 4                # f32 partials / temporaries
                  + Lt * 4)                       # interior mask
    try:
        vmem_cap = int(pltpu.get_tpu_info().vmem_capacity_bytes)
    except Exception:
        vmem_cap = 64 * 1024 * 1024
    vmem_limit = int(min(max(32 * 1024 * 1024, 4 * tile_bytes),
                         max(vmem_cap - 16 * 1024 * 1024, 16 * 1024 * 1024)))

    out = pl.pallas_call(
        kernel,
        out_shape=jax.ShapeDtypeStruct((T, C, Lt), jnp.float32),
        grid_spec=pltpu.PrefetchScalarGridSpec(
            num_scalar_prefetch=0,
            grid=(T,),  # >=2 batch-tile steps: pipelined DMA + shards over v7x TCs
            in_specs=[
                pl.BlockSpec((None, C, Lt), lambda t: (t, 0, 0)),   # x (padded; also identity)
                pl.BlockSpec((3, C, 3 * C), lambda t: (0, 0, 0)),   # w1 dh-slabs (BN1 folded)
                pl.BlockSpec((C, 1), lambda t: (0, 0)),             # bn1 bias
                pl.BlockSpec((3, C, 3 * C), lambda t: (0, 0, 0)),   # w2 dh-slabs (BN2 folded)
                pl.BlockSpec((C, 1), lambda t: (0, 0)),             # bn2 bias
                pl.BlockSpec((1, Lt), lambda t: (0, 0)),            # interior mask
            ],
            out_specs=pl.BlockSpec((None, C, Lt), lambda t: (t, 0, 0)),
        ),
        compiler_params=pltpu.CompilerParams(
            dimension_semantics=("parallel",),
            vmem_limit_bytes=vmem_limit),
    )(xt, w1t, b1, w2t, b2, mask)

    # ---- back to NCHW: drop lane padding, keep the interior ----
    out = (out.reshape(T, C, images_per_tile, Pp)
              .transpose(0, 2, 1, 3)
              .reshape(N, C, Pp)[:, :, :P]
              .reshape(N, C, Hp, Wp)[:, :, 1:H + 1, 1:W + 1])
    return out


def basic_block_ref(x, w1, bn1, w2, bn2, eps=1e-5):
    """Pure-JAX NCHW reference (eval-mode BN)."""
    def conv(inp, w):
        return jax.lax.conv_general_dilated(
            inp, w, window_strides=(1, 1), padding=((1, 1), (1, 1)),
            dimension_numbers=("NCHW", "OIHW", "NCHW"))

    def bn(inp, p):
        g, b, m, v = p
        sh = (1, -1, 1, 1)
        return (inp - m.reshape(sh)) / jnp.sqrt(v.reshape(sh) + eps) * g.reshape(sh) + b.reshape(sh)

    out = jax.nn.relu(bn(conv(x, w1), bn1))
    out = bn(conv(out, w2), bn2) + x
    return jax.nn.relu(out)


if __name__ == "__main__":
    # small shapes: inplanes = planes = 8, stride = 1, downsample = None
    N, C, H, W = 2, 8, 16, 16

    key = jax.random.PRNGKey(0)
    ks = jax.random.split(key, 11)

    x = jax.random.normal(ks[0], (N, C, H, W), jnp.float32)

    # conv weights, PyTorch layout (Cout, Cin, 3, 3)
    w1 = jax.random.normal(ks[1], (C, C, 3, 3), jnp.float32) * 0.1
    w2 = jax.random.normal(ks[2], (C, C, 3, 3), jnp.float32) * 0.1

    # BN params: (gamma, beta, running_mean, running_var)
    bn1 = (jax.random.uniform(ks[3], (C,), jnp.float32, 0.5, 1.5),
           jax.random.normal(ks[4], (C,), jnp.float32) * 0.1,
           jax.random.normal(ks[5], (C,), jnp.float32) * 0.1,
           jax.random.uniform(ks[6], (C,), jnp.float32, 0.5, 1.5))
    bn2 = (jax.random.uniform(ks[7], (C,), jnp.float32, 0.5, 1.5),
           jax.random.normal(ks[8], (C,), jnp.float32) * 0.1,
           jax.random.normal(ks[9], (C,), jnp.float32) * 0.1,
           jax.random.uniform(ks[10], (C,), jnp.float32, 0.5, 1.5))

    ref = jax.block_until_ready(basic_block_ref(x, w1, bn1, w2, bn2))

    # exact-semantics check: f32 MXU operands
    out_f32 = jax.block_until_ready(
        basic_block_pallas(x, w1, bn1, w2, bn2, compute_dtype=jnp.float32))
    np.testing.assert_allclose(np.asarray(out_f32), np.asarray(ref),
                               rtol=1e-4, atol=1e-4)

    # fast path: bf16 MXU operands with f32 accumulation (looser tolerance:
    # two stacked K=72 convs in bf16 give ~1e-2 worst-case absolute error)
    out_bf16 = jax.block_until_ready(
        basic_block_pallas(x, w1, bn1, w2, bn2, compute_dtype=jnp.bfloat16))
    np.testing.assert_allclose(np.asarray(out_bf16), np.asarray(ref),
                               rtol=5e-2, atol=5e-2)

    print("KERNEL_OK")
</pallas_src>

<mosaic_0001>
module attributes {stable_mosaic.version = 11 : i64} {
  func.func @kernel(%arg0: i32, %arg1: memref<1x8x384xf32, #tpu.memory_space<vmem>>, %arg2: memref<3x8x24xf32, #tpu.memory_space<vmem>>, %arg3: memref<8x1xf32, #tpu.memory_space<vmem>>, %arg4: memref<3x8x24xf32, #tpu.memory_space<vmem>>, %arg5: memref<8x1xf32, #tpu.memory_space<vmem>>, %arg6: memref<1x384xf32, #tpu.memory_space<vmem>>, %arg7: memref<1x8x384xf32, #tpu.memory_space<vmem>>) attributes {dimension_semantics = [#tpu.dimension_semantics<parallel>], iteration_bounds = array<i64: 2>, scalar_prefetch = 0 : i64, scratch_operands = 0 : i64, tpu.core_type = #tpu.core_type<tc>, window_params = [{transform_indices = @transform_0, window_bounds = array<i64: 1, 8, 384>}, {pipeline_mode = #tpu.pipeline_mode<synchronous>, transform_indices = @transform_1, window_bounds = array<i64: 3, 8, 24>}, {pipeline_mode = #tpu.pipeline_mode<synchronous>, transform_indices = @transform_2, window_bounds = array<i64: 8, 1>}, {pipeline_mode = #tpu.pipeline_mode<synchronous>, transform_indices = @transform_3, window_bounds = array<i64: 3, 8, 24>}, {pipeline_mode = #tpu.pipeline_mode<synchronous>, transform_indices = @transform_4, window_bounds = array<i64: 8, 1>}, {pipeline_mode = #tpu.pipeline_mode<synchronous>, transform_indices = @transform_5, window_bounds = array<i64: 1, 384>}, {transform_indices = @transform_6, window_bounds = array<i64: 1, 8, 384>}]} {
    %c0 = arith.constant 0 : index
    %c0_0 = arith.constant 0 : index
    %0 = vector.load %arg6[%c0, %c0_0] : memref<1x384xf32, #tpu.memory_space<vmem>>, vector<1x384xf32>
    %cst = arith.constant 5.000000e-01 : f32
    %1 = vector.broadcast %cst : f32 to vector<1x384xf32>
    %2 = arith.cmpf ogt, %0, %1 : vector<1x384xf32>
    %c0_1 = arith.constant 0 : index
    %c0_2 = arith.constant 0 : index
    %c0_3 = arith.constant 0 : index
    %3 = vector.load %arg1[%c0_1, %c0_2, %c0_3] : memref<1x8x384xf32, #tpu.memory_space<vmem>>, vector<1x8x384xf32>
    %4 = vector.shape_cast %3 : vector<1x8x384xf32> to vector<8x384xf32>
    %c19_i32 = arith.constant 19 : i32
    %5 = tpu.dynamic_rotate %4 by %c19_i32 dim 1 : vector<8x384xf32>, i32 -> vector<8x384xf32>
    %c18_i32 = arith.constant 18 : i32
    %6 = tpu.dynamic_rotate %4 by %c18_i32 dim 1 : vector<8x384xf32>, i32 -> vector<8x384xf32>
    %c17_i32 = arith.constant 17 : i32
    %7 = tpu.dynamic_rotate %4 by %c17_i32 dim 1 : vector<8x384xf32>, i32 -> vector<8x384xf32>
    %8 = tpu.concatenate %5, %6, %7 in 0 : vector<8x384xf32>, vector<8x384xf32>, vector<8x384xf32> -> vector<24x384xf32>
    %c0_4 = arith.constant 0 : index
    %c0_5 = arith.constant 0 : index
    %c0_6 = arith.constant 0 : index
    %9 = vector.load %arg2[%c0_4, %c0_5, %c0_6] : memref<3x8x24xf32, #tpu.memory_space<vmem>>, vector<1x8x24xf32>
    %10 = vector.shape_cast %9 : vector<1x8x24xf32> to vector<8x24xf32>
    %cst_7 = arith.constant dense<0.000000e+00> : vector<8x384xf32>
    %11 = tpu.matmul %10, %8, %cst_7 {dimension_numbers = #tpu.dot_dimension_numbers<[1], [0], [0], [1], [0, 0, 1, 1], [], []>} : vector<8x24xf32>, vector<24x384xf32>, vector<8x384xf32> -> vector<8x384xf32>
    %c1_i32 = arith.constant 1 : i32
    %12 = tpu.dynamic_rotate %4 by %c1_i32 dim 1 : vector<8x384xf32>, i32 -> vector<8x384xf32>
    %c383_i32 = arith.constant 383 : i32
    %13 = tpu.dynamic_rotate %4 by %c383_i32 dim 1 : vector<8x384xf32>, i32 -> vector<8x384xf32>
    %14 = tpu.concatenate %12, %4, %13 in 0 : vector<8x384xf32>, vector<8x384xf32>, vector<8x384xf32> -> vector<24x384xf32>
    %c1 = arith.constant 1 : index
    %c0_8 = arith.constant 0 : index
    %c0_9 = arith.constant 0 : index
    %15 = vector.load %arg2[%c1, %c0_8, %c0_9] : memref<3x8x24xf32, #tpu.memory_space<vmem>>, vector<1x8x24xf32>
    %16 = vector.shape_cast %15 : vector<1x8x24xf32> to vector<8x24xf32>
    %cst_10 = arith.constant dense<0.000000e+00> : vector<8x384xf32>
    %17 = tpu.matmul %16, %14, %cst_10 {dimension_numbers = #tpu.dot_dimension_numbers<[1], [0], [0], [1], [0, 0, 1, 1], [], []>} : vector<8x24xf32>, vector<24x384xf32>, vector<8x384xf32> -> vector<8x384xf32>
    %18 = arith.addf %11, %17 : vector<8x384xf32>
    %c367_i32 = arith.constant 367 : i32
    %19 = tpu.dynamic_rotate %4 by %c367_i32 dim 1 : vector<8x384xf32>, i32 -> vector<8x384xf32>
    %c366_i32 = arith.constant 366 : i32
    %20 = tpu.dynamic_rotate %4 by %c366_i32 dim 1 : vector<8x384xf32>, i32 -> vector<8x384xf32>
    %c365_i32 = arith.constant 365 : i32
    %21 = tpu.dynamic_rotate %4 by %c365_i32 dim 1 : vector<8x384xf32>, i32 -> vector<8x384xf32>
    %22 = tpu.concatenate %19, %20, %21 in 0 : vector<8x384xf32>, vector<8x384xf32>, vector<8x384xf32> -> vector<24x384xf32>
    %c2 = arith.constant 2 : index
    %c0_11 = arith.constant 0 : index
    %c0_12 = arith.constant 0 : index
    %23 = vector.load %arg2[%c2, %c0_11, %c0_12] : memref<3x8x24xf32, #tpu.memory_space<vmem>>, vector<1x8x24xf32>
    %24 = vector.shape_cast %23 : vector<1x8x24xf32> to vector<8x24xf32>
    %cst_13 = arith.constant dense<0.000000e+00> : vector<8x384xf32>
    %25 = tpu.matmul %24, %22, %cst_13 {dimension_numbers = #tpu.dot_dimension_numbers<[1], [0], [0], [1], [0, 0, 1, 1], [], []>} : vector<8x24xf32>, vector<24x384xf32>, vector<8x384xf32> -> vector<8x384xf32>
    %26 = arith.addf %18, %25 : vector<8x384xf32>
    %c0_14 = arith.constant 0 : index
    %c0_15 = arith.constant 0 : index
    %27 = vector.load %arg3[%c0_14, %c0_15] : memref<8x1xf32, #tpu.memory_space<vmem>>, vector<8x1xf32>
    %28 = vector.broadcast %27 : vector<8x1xf32> to vector<8x384xf32>
    %29 = arith.addf %26, %28 : vector<8x384xf32>
    %cst_16 = arith.constant 0.000000e+00 : f32
    %30 = vector.broadcast %cst_16 : f32 to vector<8x384xf32>
    %31 = arith.maximumf %29, %30 : vector<8x384xf32>
    %cst_17 = arith.constant 0.000000e+00 : f32
    %32 = vector.shape_cast %2 : vector<1x384xi1> to vector<1x384xi1>
    %33 = vector.broadcast %32 : vector<1x384xi1> to vector<8x384xi1>
    %34 = vector.broadcast %cst_17 : f32 to vector<8x384xf32>
    %35 = arith.select %33, %31, %34 : vector<8x384xi1>, vector<8x384xf32>
    %c19_i32_18 = arith.constant 19 : i32
    %36 = tpu.dynamic_rotate %35 by %c19_i32_18 dim 1 : vector<8x384xf32>, i32 -> vector<8x384xf32>
    %c18_i32_19 = arith.constant 18 : i32
    %37 = tpu.dynamic_rotate %35 by %c18_i32_19 dim 1 : vector<8x384xf32>, i32 -> vector<8x384xf32>
    %c17_i32_20 = arith.constant 17 : i32
    %38 = tpu.dynamic_rotate %35 by %c17_i32_20 dim 1 : vector<8x384xf32>, i32 -> vector<8x384xf32>
    %39 = tpu.concatenate %36, %37, %38 in 0 : vector<8x384xf32>, vector<8x384xf32>, vector<8x384xf32> -> vector<24x384xf32>
    %c0_21 = arith.constant 0 : index
    %c0_22 = arith.constant 0 : index
    %c0_23 = arith.constant 0 : index
    %40 = vector.load %arg4[%c0_21, %c0_22, %c0_23] : memref<3x8x24xf32, #tpu.memory_space<vmem>>, vector<1x8x24xf32>
    %41 = vector.shape_cast %40 : vector<1x8x24xf32> to vector<8x24xf32>
    %cst_24 = arith.constant dense<0.000000e+00> : vector<8x384xf32>
    %42 = tpu.matmul %41, %39, %cst_24 {dimension_numbers = #tpu.dot_dimension_numbers<[1], [0], [0], [1], [0, 0, 1, 1], [], []>} : vector<8x24xf32>, vector<24x384xf32>, vector<8x384xf32> -> vector<8x384xf32>
    %c1_i32_25 = arith.constant 1 : i32
    %43 = tpu.dynamic_rotate %35 by %c1_i32_25 dim 1 : vector<8x384xf32>, i32 -> vector<8x384xf32>
    %c383_i32_26 = arith.constant 383 : i32
    %44 = tpu.dynamic_rotate %35 by %c383_i32_26 dim 1 : vector<8x384xf32>, i32 -> vector<8x384xf32>
    %45 = tpu.concatenate %43, %35, %44 in 0 : vector<8x384xf32>, vector<8x384xf32>, vector<8x384xf32> -> vector<24x384xf32>
    %c1_27 = arith.constant 1 : index
    %c0_28 = arith.constant 0 : index
    %c0_29 = arith.constant 0 : index
    %46 = vector.load %arg4[%c1_27, %c0_28, %c0_29] : memref<3x8x24xf32, #tpu.memory_space<vmem>>, vector<1x8x24xf32>
    %47 = vector.shape_cast %46 : vector<1x8x24xf32> to vector<8x24xf32>
    %cst_30 = arith.constant dense<0.000000e+00> : vector<8x384xf32>
    %48 = tpu.matmul %47, %45, %cst_30 {dimension_numbers = #tpu.dot_dimension_numbers<[1], [0], [0], [1], [0, 0, 1, 1], [], []>} : vector<8x24xf32>, vector<24x384xf32>, vector<8x384xf32> -> vector<8x384xf32>
    %49 = arith.addf %42, %48 : vector<8x384xf32>
    %c367_i32_31 = arith.constant 367 : i32
    %50 = tpu.dynamic_rotate %35 by %c367_i32_31 dim 1 : vector<8x384xf32>, i32 -> vector<8x384xf32>
    %c366_i32_32 = arith.constant 366 : i32
    %51 = tpu.dynamic_rotate %35 by %c366_i32_32 dim 1 : vector<8x384xf32>, i32 -> vector<8x384xf32>
    %c365_i32_33 = arith.constant 365 : i32
    %52 = tpu.dynamic_rotate %35 by %c365_i32_33 dim 1 : vector<8x384xf32>, i32 -> vector<8x384xf32>
    %53 = tpu.concatenate %50, %51, %52 in 0 : vector<8x384xf32>, vector<8x384xf32>, vector<8x384xf32> -> vector<24x384xf32>
    %c2_34 = arith.constant 2 : index
    %c0_35 = arith.constant 0 : index
    %c0_36 = arith.constant 0 : index
    %54 = vector.load %arg4[%c2_34, %c0_35, %c0_36] : memref<3x8x24xf32, #tpu.memory_space<vmem>>, vector<1x8x24xf32>
    %55 = vector.shape_cast %54 : vector<1x8x24xf32> to vector<8x24xf32>
    %cst_37 = arith.constant dense<0.000000e+00> : vector<8x384xf32>
    %56 = tpu.matmul %55, %53, %cst_37 {dimension_numbers = #tpu.dot_dimension_numbers<[1], [0], [0], [1], [0, 0, 1, 1], [], []>} : vector<8x24xf32>, vector<24x384xf32>, vector<8x384xf32> -> vector<8x384xf32>
    %57 = arith.addf %49, %56 : vector<8x384xf32>
    %c0_38 = arith.constant 0 : index
    %c0_39 = arith.constant 0 : index
    %58 = vector.load %arg5[%c0_38, %c0_39] : memref<8x1xf32, #tpu.memory_space<vmem>>, vector<8x1xf32>
    %59 = vector.broadcast %58 : vector<8x1xf32> to vector<8x384xf32>
    %60 = arith.addf %57, %59 : vector<8x384xf32>
    %c0_40 = arith.constant 0 : index
    %c0_41 = arith.constant 0 : index
    %c0_42 = arith.constant 0 : index
    %61 = vector.load %arg1[%c0_40, %c0_41, %c0_42] : memref<1x8x384xf32, #tpu.memory_space<vmem>>, vector<1x8x384xf32>
    %62 = vector.shape_cast %61 : vector<1x8x384xf32> to vector<8x384xf32>
    %63 = arith.addf %60, %62 : vector<8x384xf32>
    %cst_43 = arith.constant 0.000000e+00 : f32
    %64 = vector.broadcast %cst_43 : f32 to vector<8x384xf32>
    %65 = arith.maximumf %63, %64 : vector<8x384xf32>
    %c0_44 = arith.constant 0 : index
    %c0_45 = arith.constant 0 : index
    %c0_46 = arith.constant 0 : index
    %66 = vector.load %arg7[%c0_44, %c0_45, %c0_46] : memref<1x8x384xf32, #tpu.memory_space<vmem>>, vector<1x8x384xf32>
    %67 = vector.shape_cast %66 : vector<1x8x384xf32> to vector<8x384xf32>
    %68 = vector.shape_cast %65 : vector<8x384xf32> to vector<1x8x384xf32>
    tpu.vector_store %arg7[%c0_44, %c0_45, %c0_46], %68 {strides = array<i32>} : memref<1x8x384xf32, #tpu.memory_space<vmem>>, vector<1x8x384xf32>,
    return
  }
  func.func @transform_0(%arg0: i32) -> (i32, i32, i32) {
    %c0_i32 = arith.constant 0 : i32
    %c0_i32_0 = arith.constant 0 : i32
    %c0_i32_1 = arith.constant 0 : i32
    return %arg0, %c0_i32, %c0_i32_0 : i32, i32, i32
  }
  func.func @transform_1(%arg0: i32) -> (i32, i32, i32) {
    %c0_i32 = arith.constant 0 : i32
    %c0_i32_0 = arith.constant 0 : i32
    %c0_i32_1 = arith.constant 0 : i32
    %c0_i32_2 = arith.constant 0 : i32
    return %c0_i32, %c0_i32_0, %c0_i32_1 : i32, i32, i32
  }
  func.func @transform_2(%arg0: i32) -> (i32, i32) {
    %c0_i32 = arith.constant 0 : i32
    %c0_i32_0 = arith.constant 0 : i32
    %c0_i32_1 = arith.constant 0 : i32
    return %c0_i32, %c0_i32_0 : i32, i32
  }
  func.func @transform_3(%arg0: i32) -> (i32, i32, i32) {
    %c0_i32 = arith.constant 0 : i32
    %c0_i32_0 = arith.constant 0 : i32
    %c0_i32_1 = arith.constant 0 : i32
    %c0_i32_2 = arith.constant 0 : i32
    return %c0_i32, %c0_i32_0, %c0_i32_1 : i32, i32, i32
  }
  func.func @transform_4(%arg0: i32) -> (i32, i32) {
    %c0_i32 = arith.constant 0 : i32
    %c0_i32_0 = arith.constant 0 : i32
    %c0_i32_1 = arith.constant 0 : i32
    return %c0_i32, %c0_i32_0 : i32, i32
  }
  func.func @transform_5(%arg0: i32) -> (i32, i32) {
    %c0_i32 = arith.constant 0 : i32
    %c0_i32_0 = arith.constant 0 : i32
    %c0_i32_1 = arith.constant 0 : i32
    return %c0_i32, %c0_i32_0 : i32, i32
  }
  func.func @transform_6(%arg0: i32) -> (i32, i32, i32) {
    %c0_i32 = arith.constant 0 : i32
    %c0_i32_0 = arith.constant 0 : i32
    %c0_i32_1 = arith.constant 0 : i32
    return %arg0, %c0_i32, %c0_i32_0 : i32, i32, i32
  }
}

</mosaic_0001>

<bundles_post_ra>
// kernel: tpu_custom_call.1
= control target key start
LH: loop header
LB: loop body
LE: loop exit
PB: predicated region body
PF: predicated region fallthrough
CT: control target
= control target key end

     0   :  { %s2338_s0 = inlined_call_operand.hbm [shape: f32[2,8,384], index: 0, kind: input, shape index: {}]   ;;  %s2339_s1 = inlined_call_operand.hbm [shape: f32[3,8,24], index: 1, kind: input, shape index: {}]   ;;  %s2340_s2 = inlined_call_operand.vmem [shape: f32[8,1], index: 2, kind: input, shape index: {}]   ;;  %s2341_s3 = inlined_call_operand.hbm [shape: f32[3,8,24], index: 3, kind: input, shape index: {}]   ;;  %s2342_s4 = inlined_call_operand.vmem [shape: f32[8,1], index: 4, kind: input, shape index: {}]   ;;  %s2343_s5 = inlined_call_operand.vmem [shape: f32[1,384], index: 5, kind: input, shape index: {}]   ;;  %s2344_s6 = inlined_call_operand.hbm [shape: f32[2,8,384], index: 6, kind: output, shape index: {}]  }
   0x1   :  { %2349 = sst [smem:[#allocation12_spill]] %s2339_s1 }
   0x2   :  { %11 = vsyncpa [#allocation3], 0 }
   0x3   :  { %13 = vsyncpa [#allocation3 + $0x1], 0 }
   0x4   :  { %14 = vsyncpa [#allocation6], 0 }
   0x5   :  { %15 = vsyncpa [#allocation4], 0 }
   0x6   :  { %17 = vsyncpa [#allocation4 + $0x1], 0  ;;  %s1882_s21 = smov 0   ;;  %s1884_s22 = smov 0  }
   0x7   :  { %s1886_s23 = smov 0   ;;  %s1888_s24 = smov 0  }
   0x8 LB: > { %s1903_s25 = sadd.s32 4294967295, %s1828_s24   ;;  %s1490_s26 = sadd.s32 4294967294, %s1828_s24   ;;  %s1828_s24 = sphi %s1888_s24, %s2368_s24   ;;  %s1824_s23 = sphi %s1886_s23, %s2367_s23   ;;  %s1820_s22 = sphi %s1884_s22, %s2366_s22   ;;  %s1816_s21 = sphi %s1882_s21, %s2365_s21  }
   0x9   : > { %p43_p0 = scmp.ne.s32.totalorder %s1820_s22, %s1816_s21  ;;  %p2345_p1 = scmp.eq.s32.totalorder %s1903_s25, 0 }
   0xa   : > { %p178_p3 = scmp.eq.s32.totalorder %s1490_s26, 1  ;;  %p1491_p5 = scmp.ge.s32.totalorder %s1828_s24, 1 }
   0xb   : > { %p1912_p4 = por %p2345_p1, %p43_p0  ;;  %p185_p7 = scmp.lt.s32.totalorder %s1828_s24, 3 }
   0xc   : > { %p1917_p6 = por %p178_p3, %p43_p0  ;;  %s1830_s30 = smov [#allocation5]  }
   0xd   : > { %s2350_s27 = scalar_select %p1912_p4, 1, 0 }
   0xe   : > { %s2351_s28 = scalar_select %p1917_p6, 1, 0 }
   0xf   : > { %p1922_p8 = pnand %p1491_p5, %p185_p7  ;;  %s197_s7 = sshll.u32 %s1830_s30, 4  ;;  %s198_s7 = int_to_ptr.vmem [resolvable:$true] %s197_s7 }
  0x10   : > { %s1831_s9 = smov [#allocation7]   ;;  %s1691_s11 = scalar_lea.vmem %s198_s7, 384 }
  0x11   : > { %s2352_s29 = scalar_select %p1922_p8, 1, 0 }
  0x12   : > { %p1611_p9 = pneg %p1922_p8  ;;  %s213_s10 = sshll.u32 %s1831_s9, 4  ;;  %s214_s10 = int_to_ptr.vmem [resolvable:$true] %s213_s10 }
  0x13   : > { %p1692_p13 = scmp.ne.s32.totalorder %s198_s7, %s1691_s11  ;;  %p1699_p5 = scmp.lt.s32.totalorder %s198_s7, %s198_s7 }
  0x14   : > { %p1931_p11 = pnand %p1611_p9, %p2345_p1  ;;  %p1700_p7 = scmp.lt.s32.totalorder %s1691_s11, %s1691_s11 }
  0x16   : > { %p1682_p12 = pneg %p1931_p11  ;;  %p1701_p10 = por %p1700_p7, %p1699_p5 }
  0x18   : > { %p1694_p0 = pnand %p1692_p13, %p1682_p12 }
  0x1a   : > { %p1695_p3 = pneg %p1694_p0 }
  0x1c   : > { %p1702_p9 = pnand %p1701_p10, %p1695_p3 }
  0x1e   : > { %1705 = shalt.err (!%p1702_p9)
}
  0x1f   : > { %s1832_s12 = smov 128   ;;  %s1833_s13 = smov 8  }
  0x20   : > { %s2354_s1 = sld [smem:[#allocation12_spill]]  ;;  %s1717_s16 = scalar_lea.vmem %s214_s10, 384 }
  0x21   : > { %p1718_p1 = scmp.ne.s32.totalorder %s214_s10, %s1717_s16  ;;  %p1725_p2 = scmp.lt.s32.totalorder %s214_s10, %s214_s10 }
  0x22   : > { %p1726_p6 = scmp.lt.s32.totalorder %s1717_s16, %s1717_s16 }
  0x23   : > { %p1720_p13 = pnand %p1718_p1, %p1682_p12 }
  0x24   : > { %p1727_p5 = por %p1726_p6, %p1725_p2 }
  0x25   : > { %p1721_p0 = pneg %p1720_p13 }
  0x26   : > { %1614 = dma.hbm_to_vmem [thread:$0]  (!%p1931_p11), %s2354_s1, 384, %s198_s7, [#allocation6], %s1832_s12, %s1832_s12, %s1833_s13  }
  0x27   : > { %p1728_p10 = pnand %p1727_p5, %p1721_p0 }
  0x29   : > { %1731 = shalt.err (!%p1728_p10)
}
  0x2a   : > { %1617 = dma.hbm_to_vmem [thread:$0]  (!%p1931_p11), %s2341_s3, 384, %s214_s10, [#allocation6], %s1832_s12, %s1832_s12, %s1833_s13  }
  0x2b   : > { %s1954_s19 = sadd.s32 1, %s1828_s24   ;;  %s30_s20 = sadd.s32 1, %s1824_s23 }
  0x2c   : > { %s27_s26 = ssub.s32 %s1828_s24, %s1954_s19  ;;  %p37_p1 = scmp.ne.s32.totalorder %s1824_s23, %s1820_s22 }
  0x2d   : > { %p28_p2 = scmp.eq.s32.totalorder %s27_s26, 0  ;;  %p38_p6 = scmp.eq.s32.totalorder %s1828_s24, 0 }
  0x2e   : > { %p2355_p12 = scmp.eq.s32.totalorder %s1903_s25, 1  ;;  %p1628_p7 = scmp.lt.s32.totalorder %s1828_s24, 2 }
  0x2f   : > { %s1970_s7 = scalar_select %p28_p2, %s1824_s23, %s30_s20  }
  0x30   : > { %p1964_p3 = por %p2355_p12, %p37_p1  ;;  %p39_p9 = por %p38_p6, %p37_p1 }
  0x31   : > { %s233_s8 = sand.u32 1, %s1824_s23   ;;  %s1596_s10 = smul.u32 384, %s1828_s24 }
  0x32   : > { %s2356_s30 = scalar_select %p1964_p3, 1, 0 }
  0x33   : > { %s1595_s9 = smul.u32 24, %s233_s8  ;;  %p1974_p11 = pnand %p1628_p7, %p39_p9 }
  0x34   : > { %s1981_s14 = scalar_lea.hbm %s2338_s0, %s1596_s10  ;;  %s234_s17 = scalar_lea.sflag [#allocation3], %s233_s8 }
  0x35   : > { %s237_s15 = scalar_lea.vmem [#allocation2], %s1595_s9  ;;  %s1732_s18 = scalar_lea.hbm %s1981_s14, 384 }
  0x36   : > { %s245_s16 = sshll.u32 %s237_s15, 4  ;;  %p1733_p13 = scmp.ne.s32.totalorder %s1981_s14, %s1732_s18  ;;  %s246_s16 = int_to_ptr.vmem [resolvable:$true] %s245_s16 }
  0x37   : > { %p1734_p0 = pneg %p1974_p11  ;;  %s1737_s12 = scalar_lea.hbm %s2338_s0, 768 }
  0x38   : > { %p1738_p1 = scmp.lt.s32.totalorder %s1981_s14, %s2338_s0  ;;  %p1739_p2 = scmp.lt.s32.totalorder %s1737_s12, %s1732_s18 }
  0x39   : > { %p1735_p5 = pnand %p1734_p0, %p1733_p13 }
  0x3a   : > { %p1740_p6 = por %p1739_p2, %p1738_p1 }
  0x3b   : > { %p1736_p10 = pneg %p1735_p5 }
  0x3d   : > { %p1741_p12 = pnand %p1740_p6, %p1736_p10 }
  0x3f   : > { %1744 = shalt.err (!%p1741_p12)
}
  0x40   : > { %s1745_s9 = scalar_lea.vmem %s246_s16, 384  ;;  %s1834_s8 = smov [#allocation2]  }
  0x41   : > { %p1746_p7 = scmp.ne.s32.totalorder %s246_s16, %s1745_s9  ;;  %s1750_s15 = sshll.u32 %s1834_s8, 4  ;;  %s1751_s15 = int_to_ptr.vmem [resolvable:$false] %s1750_s15 }
  0x42   : > { %s1752_s1 = scalar_lea.vmem %s1751_s15, 768  ;;  %p1753_p13 = scmp.lt.s32.totalorder %s246_s16, %s1751_s15 }
  0x43   : > { %p1748_p9 = pnand %p1746_p7, %p1734_p0  ;;  %p1754_p5 = scmp.lt.s32.totalorder %s1752_s1, %s1745_s9 }
  0x45   : > { %p1749_p3 = pneg %p1748_p9  ;;  %p1755_p4 = por %p1754_p5, %p1753_p13 }
  0x47   : > { %p1756_p8 = pnand %p1755_p4, %p1749_p3 }
  0x49   : > { %1759 = shalt.err (!%p1756_p8)
}
  0x4a   : > { %1621 = dma.hbm_to_vmem [thread:$0]  (!%p1974_p11), %s1981_s14, 384, %s246_s16, %s234_s17  }
  0x4b   : > { %p2358_p10 = scmp.ne.s32.totalorder %s2352_s29, 0 }
  0x4c   : > { %s2000_s18 = sand.u32 (!%p2358_p10), 1, %s1820_s22   ;;  %p2359_p4 = scmp.ne.s32.totalorder (!%p2358_p10), %s2350_s27, 0 }
  0x4d   : > { %254 = sbr.rel (%p2358_p10) target bundleno = 830 (0x33e), region = 44  ;;  %s257_s26 = scalar_lea.sflag (!%p2358_p10), [#allocation3], %s2000_s18 }
  0x4e   : > { %s1597_s20 = smul.u32 (!%p2358_p10), 24, %s2000_s18 }
  0x50   : > { %s260_s1 = scalar_lea.vmem (!%p2358_p10), [#allocation2], %s1597_s20 }
  0x52   : > { %1803 = dma.done.wait (%p2359_p4), %s257_s26, 384  }
  0x53   : > { %1805 = vsyncadd (%p2359_p4), %s257_s26, 4294966912  ;;  %p2360_p8 = scmp.eq.s32.totalorder %s1903_s25, 0 }
  0x55   : > { %1807 = dma.done.wait (%p2360_p8), [#allocation6], 768   ;;  %p2361_p3 = pmov %p2360_p8 }
  0x56   : > { %v1835_v0 = vmov 0.0   ;;  %v2016_v1 = vld [vmem:[%s260_s1 + $0x8] sm:$0xff]  ;;  %v2018_v2 = vld [vmem:[%s260_s1] sm:$0xff]  ;;  %s1836_s29 = smov 127   ;;  %v2024_v3 = vld [vmem:[%s260_s1 + $0x10] sm:$0xff]  ;;  %vm1837_vm0 = vmmov 0   ;;  %v308_v4 = vlaneseq }
  0x57   : > { %1809 = vsyncadd (%p2361_p3), [#allocation6], 4294966528  ;;  %1541 = vmatprep.subr.mxu1 %v1835_v0  ;;  %425 = vmatprep.mubr.f32.mxu0 %v1835_v0  ;;  %s1838_s27 = smov 1   ;;  %s1839_s11 = smov 17   ;;  %v297_v5 = vld [vmem:[%s2343_s5] sm:$0x7] }
  0x58   : > { %347 = vrot.lane.b32.xlu0 %v2016_v1, %s1836_s29  ;;  %345 = vrot.lane.b32.xlu1 %v2018_v2, %s1836_s29  ;;  %s1840_s14 = smov 18   ;;  %s1841_s16 = smov 19   ;;  %v839_v6 = vshrl.u32 %v308_v4, 7  ;;  %v1843_v7 = vmov 0   ;;  %vm298_vm1 = vcmp.gt.f32.partialorder %v297_v5, 0.5  ;;  %v825_v15 = vld [vmem:[%s2340_s2] sm:$0xff] }
  0x59   : > { %1547 = vmatprep.mubr.msk.f32.mxu1 %vm1837_vm0, %v1835_v0  ;;  %s1842_s17 = smov 109   ;;  %1679 = vset.pattern.permute.xlu0 %v1843_v7  ;;  %s1844_s10 = smov 110   ;;  %v837_v8 = vsel %vm298_vm1, 1, %v1843_v7  ;;  %v2084_v16 = vand.u32 127, %v308_v4  ;;  %v356_v29 = vld [vmem:[#allocation5 + $0x8] sm:$0xff]  ;;  %vm357_vm4 = vcmask 195584  }
  0x5a   : > { %v840_v9 = vsub.s32 0, %v839_v6  ;;  %v844_v10 = vsub.s32 1, %v839_v6  ;;  %v848_v11 = vsub.s32 2, %v839_v6  ;;  %s1845_s9 = smov 111   ;;  %v334_v47 = vld [vmem:[#allocation5] sm:$0xff]  ;;  %v677_v4 = vld [vmem:[#allocation5 + $0x10] sm:$0xff] }
  0x5b   : > { %vm351_vm2 = vcmp.lt.s32.totalorder %v2084_v16, 127  ;;  %vm341_vm3 = vcmp.lt.s32.totalorder %v2084_v16, 1  ;;  %vm330_vm5 = vcmp.lt.s32.totalorder %v2084_v16, 17  ;;  %vm320_vm6 = vcmp.lt.s32.totalorder %v2084_v16, 18  ;;  %s1387_s12 = scalar_lea.sflag [#allocation4], %s2000_s18  ;;  %p2362_p0 = scmp.ne.s32.totalorder %s2356_s30, 0 }
  0x5c   : > { %349 = vrot.lane.b32.xlu0 %v2024_v3, %s1836_s29  ;;  %335 = vrot.lane.b32.xlu1 %v2018_v2, %s1838_s27  ;;  %v2067_v12 = vrot.slane %v837_v8, %v840_v9  ;;  %v2069_v13 = vrot.slane %v837_v8, %v844_v10  ;;  %v2071_v14 = vrot.slane %v837_v8, %v848_v11  ;;  %vm310_vm7 = vcmp.lt.s32.totalorder %v2084_v16, 19 }
  0x5d   : > { %vm672_vm8 = vcmp.lt.s32.totalorder %v2084_v16, 109  ;;  %vm662_vm9 = vcmp.lt.s32.totalorder %v2084_v16, 110  ;;  %vm652_vm10 = vcmp.lt.s32.totalorder %v2084_v16, 111 }
  0x5e   : > { %vm852_vm11 = vcmp.eq.s32.totalorder %v2071_v14, 1  ;;  %vm850_vm12 = vcmp.eq.s32.totalorder %v2067_v12, 1  ;;  %vm851_vm13 = vcmp.eq.s32.totalorder %v2069_v13, 1 }
  0x60   : > { %337 = vrot.lane.b32.xlu0 %v2016_v1, %s1838_s27  ;;  %339 = vrot.lane.b32.xlu1 %v2024_v3, %s1838_s27 }
  0x64   : > { %324 = vrot.lane.b32.xlu0 %v2018_v2, %s1839_s11  ;;  %326 = vrot.lane.b32.xlu1 %v2016_v1, %s1839_s11 }
  0x68   : > { %328 = vrot.lane.b32.xlu0 %v2024_v3, %s1839_s11  ;;  %314 = vrot.lane.b32.xlu1 %v2018_v2, %s1840_s14 }
  0x6c   : > { %316 = vrot.lane.b32.xlu0 %v2016_v1, %s1840_s14  ;;  %318 = vrot.lane.b32.xlu1 %v2024_v3, %s1840_s14 }
  0x70   : > { %302 = vrot.lane.b32.xlu0 %v2018_v2, %s1841_s16  ;;  %304 = vrot.lane.b32.xlu1 %v2016_v1, %s1841_s16 }
  0x74   : > { %306 = vrot.lane.b32.xlu0 %v2024_v3, %s1841_s16  ;;  %668 = vrot.lane.b32.xlu1 %v2016_v1, %s1842_s17 }
  0x78   : > { %670 = vrot.lane.b32.xlu0 %v2024_v3, %s1842_s17  ;;  %666 = vrot.lane.b32.xlu1 %v2018_v2, %s1842_s17 }
  0x7c   : > { %658 = vrot.lane.b32.xlu0 %v2016_v1, %s1844_s10  ;;  %660 = vrot.lane.b32.xlu1 %v2024_v3, %s1844_s10 }
  0x80   : > { %656 = vrot.lane.b32.xlu0 %v2018_v2, %s1844_s10  ;;  %648 = vrot.lane.b32.xlu1 %v2016_v1, %s1845_s9 }
  0x84   : > { %650 = vrot.lane.b32.xlu0 %v2024_v3, %s1845_s9  ;;  %646 = vrot.lane.b32.xlu1 %v2018_v2, %s1845_s9 }
  0x88   : > { %828 = vperm.xlu0 %1679, %v825_v15  }
  0xca   : > { %v348_v17 = vpop.permute.xlu0 %347  ;;  %v346_v18 = vpop.permute.xlu1 %345 }
  0xcb   : > { %v353_v23 = vsel %vm351_vm2, %v346_v18, %v348_v17 }
  0xce   : > { %v350_v19 = vpop.permute.xlu0 %349  ;;  %v336_v20 = vpop.permute.xlu1 %335 }
  0xcf   : > { %v352_v21 = vsel %vm351_vm2, %v348_v17, %v350_v19  ;;  %v354_v22 = vsel %vm351_vm2, %v350_v19, %v346_v18 }
  0xd0   : > { %387 = vmatprep.subr.mxu0 %v352_v21  ;;  %1542 = vmatpush3.msra.mxu1 %v354_v22 }
  0xd1   : > { %388 = vmatpush1.msra.mxu0 %v353_v23  ;;  %1543 = vmatprep.subr.mxu1 %v1835_v0 }
  0xd2   : > { %v338_v24 = vpop.permute.xlu0 %337  ;;  %389 = vmatprep.subr.mxu0 %v2016_v1  ;;  %1544 = vmatpush3.msra.mxu1 %v2024_v3  ;;  %v340_v25 = vpop.permute.xlu1 %339 }
  0xd3   : > { %390 = vmatpush1.msra.mxu0 %v2018_v2  ;;  %1545 = vmatprep.subr.mxu1 %v1835_v0  ;;  %v343_v26 = vsel %vm341_vm3, %v336_v20, %v338_v24  ;;  %v342_v27 = vsel %vm341_vm3, %v338_v24, %v340_v25  ;;  %v344_v28 = vsel %vm341_vm3, %v340_v25, %v336_v20 }
  0xd4   : > { %391 = vmatprep.subr.mxu0 %v343_v26  ;;  %1546 = vmatpush3.msra.mxu1 %v342_v27 }
  0xd5   : > { %392 = vmatpush1.msra.mxu0 %v344_v28  ;;  %1550 = vmatprep.subr.mxu1 %v1835_v0 }
  0xd6   : > { %v325_v30 = vpop.permute.xlu0 %324  ;;  %v327_v31 = vpop.permute.xlu1 %326  ;;  %1499 = vmatmul.mubr.msk.f32.vlgmr.msra.gmra.mxu0 %vm357_vm4, %v356_v29  ;;  %1548 = vmatmul.mubr.msk.f32.vlgmr.msra.gmra.mxu1 %vm357_vm4, %v356_v29 }
  0xd7   : > { %v332_v32 = vsel %vm330_vm5, %v325_v30, %v327_v31  ;;  %1556 = vmatprep.mubr.msk.f32.mxu1 %vm1837_vm0, %v1835_v0  ;;  %569 = vmatprep.mubr.f32.mxu0 %v1835_v0 }
  0xd8   : > { %531 = vmatprep.subr.mxu0 %v332_v32 }
  0xda   : > { %v329_v33 = vpop.permute.xlu0 %328  ;;  %v315_v34 = vpop.permute.xlu1 %314 }
  0xdb   : > { %v331_v35 = vsel %vm330_vm5, %v327_v31, %v329_v33  ;;  %v333_v36 = vsel %vm330_vm5, %v329_v33, %v325_v30 }
  0xdc   : > { %532 = vmatpush1.msra.mxu0 %v333_v36  ;;  %1551 = vmatpush3.msra.mxu1 %v331_v35 }
  0xdd   : > { %1552 = vmatprep.subr.mxu1 %v1835_v0 }
  0xde   : > { %v317_v37 = vpop.permute.xlu0 %316  ;;  %v319_v38 = vpop.permute.xlu1 %318 }
  0xdf   : > { %v321_v39 = vsel %vm320_vm6, %v317_v37, %v319_v38  ;;  %v323_v40 = vsel %vm320_vm6, %v319_v38, %v315_v34  ;;  %v322_v41 = vsel %vm320_vm6, %v315_v34, %v317_v37 }
  0xe0   : > { %533 = vmatprep.subr.mxu0 %v322_v41  ;;  %1553 = vmatpush3.msra.mxu1 %v321_v39 }
  0xe1   : > { %534 = vmatpush1.msra.mxu0 %v323_v40  ;;  %1554 = vmatprep.subr.mxu1 %v1835_v0  ;;  %v1368_v40 = vld [vmem:[%s2342_s4] sm:$0xff] }
  0xe2   : > { %v303_v42 = vpop.permute.xlu0 %302  ;;  %v305_v43 = vpop.permute.xlu1 %304 }
  0xe3   : > { %v312_v44 = vsel %vm310_vm7, %v303_v42, %v305_v43 }
  0xe4   : > { %535 = vmatprep.subr.mxu0 %v312_v44 }
  0xe6   : > { %v307_v45 = vpop.permute.xlu0 %306  ;;  %v669_v46 = vpop.permute.xlu1 %668 }
  0xe7   : > { %v311_v48 = vsel %vm310_vm7, %v305_v43, %v307_v45  ;;  %v313_v49 = vsel %vm310_vm7, %v307_v45, %v303_v42 }
  0xe8   : > { %536 = vmatpush1.msra.mxu0 %v313_v49  ;;  %1555 = vmatpush3.msra.mxu1 %v311_v48 }
  0xe9   : > { %1559 = vmatprep.subr.mxu1 %v1835_v0  ;;  %1557 = vmatmul.mubr.msk.f32.vlgmr.msra.gmra.mxu1 %vm357_vm4, %v334_v47 }
  0xea   : > { %v671_v50 = vpop.permute.xlu0 %670  ;;  %v667_v51 = vpop.permute.xlu1 %666  ;;  %1501 = vmatmul.mubr.msk.f32.vlgmr.msra.gmra.mxu0 %vm357_vm4, %v334_v47  ;;  %1565 = vmatprep.mubr.msk.f32.mxu1 %vm1837_vm0, %v1835_v0 }
  0xeb   : > { %v674_v52 = vsel %vm672_vm8, %v667_v51, %v669_v46  ;;  %v675_v53 = vsel %vm672_vm8, %v671_v50, %v667_v51  ;;  %v673_v54 = vsel %vm672_vm8, %v669_v46, %v671_v50  ;;  %745 = vmatprep.mubr.f32.mxu0 %v1835_v0 }
  0xec   : > { %707 = vmatprep.subr.mxu0 %v673_v54  ;;  %1560 = vmatpush3.msra.mxu1 %v675_v53 }
  0xed   : > { %708 = vmatpush1.msra.mxu0 %v674_v52  ;;  %1561 = vmatprep.subr.mxu1 %v1835_v0 }
  0xee   : > { %v659_v55 = vpop.permute.xlu0 %658  ;;  %v661_v56 = vpop.permute.xlu1 %660 }
  0xef   : > { %v663_v57 = vsel %vm662_vm9, %v659_v55, %v661_v56 }
  0xf0   : > { %709 = vmatprep.subr.mxu0 %v663_v57 }
  0xf2   : > { %v657_v58 = vpop.permute.xlu0 %656  ;;  %v649_v59 = vpop.permute.xlu1 %648 }
  0xf3   : > { %v664_v60 = vsel %vm662_vm9, %v657_v58, %v659_v55  ;;  %v665_v61 = vsel %vm662_vm9, %v661_v56, %v657_v58 }
  0xf4   : > { %710 = vmatpush1.msra.mxu0 %v664_v60  ;;  %1562 = vmatpush3.msra.mxu1 %v665_v61  ;;  %v903_v60 = vld [vmem:[#allocation7 + $0x8] sm:$0xff] }
  0xf5   : > { %1563 = vmatprep.subr.mxu1 %v1835_v0 }
  0xf6   : > { %v651_v62 = vpop.permute.xlu0 %650  ;;  %v647_v63 = vpop.permute.xlu1 %646 }
  0xf7   : > { %v654_v5 = vsel %vm652_vm10, %v647_v63, %v649_v59  ;;  %v655_v6 = vsel %vm652_vm10, %v651_v62, %v647_v63  ;;  %v653_v7 = vsel %vm652_vm10, %v649_v59, %v651_v62 }
  0xf8   : > { %711 = vmatprep.subr.mxu0 %v653_v7  ;;  %1564 = vmatpush3.msra.mxu1 %v655_v6 }
  0xf9   : > { %712 = vmatpush1.msra.mxu0 %v654_v5  ;;  %1566 = vmatmul.mubr.msk.f32.vlgmr.msra.gmra.mxu1 %vm357_vm4, %v677_v4 }
  0xfa   : > { %1503 = vmatmul.mubr.msk.f32.vlgmr.msra.gmra.mxu0 %vm357_vm4, %v677_v4  ;;  %1568 = vmatprep.subr.mxu1 %v1835_v0 }
  0xfb   : > { %1574 = vmatprep.mubr.msk.f32.mxu1 %vm1837_vm0, %v1835_v0  ;;  %971 = vmatprep.mubr.f32.mxu0 %v1835_v0 }
 0x103   : > { %v829_v20 = vpop.permute.xlu0 %828 }
 0x196   : > { %v498_v8 = vpop.f32.mrf.mxu1  ;;  %v427_v15 = vpop.f32.mrf.mxu0 }
 0x198   : > { %v1549_v9 = vpop.f32.mrf.mxu1  ;;  %v429_v17 = vpop.f32.mrf.mxu0 }
 0x1a9   : > { %v642_v10 = vpop.f32.mrf.mxu1 }
 0x1aa   : > { %v571_v18 = vpop.f32.mrf.mxu0  ;;  %v643_v19 = vadd.f32 %v642_v10, %v498_v8 }
 0x1ab   : > { %v1558_v11 = vpop.f32.mrf.mxu1  ;;  %v572_v25 = vadd.f32 %v571_v18, %v427_v15 }
 0x1ac   : > { %v573_v21 = vpop.f32.mrf.mxu0  ;;  %v883_v11 = vld [vmem:[#allocation7] sm:$0xff] }
 0x1ad   : > { %v574_v33 = vadd.f32 %v573_v21, %v429_v17 }
 0x1b9   : > { %v818_v22 = vpop.f32.mrf.mxu1 }
 0x1ba   : > { %v824_v23 = vadd.f32 %v818_v22, %v643_v19  ;;  %v747_v27 = vpop.f32.mrf.mxu0 }
 0x1bb   : > { %v1567_v24 = vpop.f32.mrf.mxu1  ;;  %v822_v29 = vadd.f32 %v747_v27, %v572_v25 }
 0x1bc   : > { %v833_v26 = vadd.f32 %v829_v20, %v824_v23  ;;  %v749_v35 = vpop.f32.mrf.mxu0 }
 0x1bd   : > { %v2174_v31 = vadd.f32 %v829_v20, %v822_v29  ;;  %v823_v36 = vadd.f32 %v749_v35, %v574_v33 }
 0x1be   : > { %v836_v28 = vmax.f32 %v833_v26, 0.0 }
 0x1bf   : > { %v834_v32 = vmax.f32 %v2174_v31, 0.0  ;;  %v832_v37 = vadd.f32 %v829_v20, %v823_v36 }
 0x1c0   : > { %v855_v30 = vsel %vm852_vm11, %v836_v28, 0.0 }
 0x1c1   : > { %878 = vrot.lane.b32.xlu0 %v855_v30, %s1839_s11  ;;  %897 = vrot.lane.b32.xlu1 %v855_v30, %s1836_s29  ;;  %v853_v34 = vsel %vm850_vm12, %v834_v32, 0.0  ;;  %v835_v38 = vmax.f32 %v832_v37, 0.0 }
 0x1c3   : > { %v854_v39 = vsel %vm851_vm13, %v835_v38, 0.0 }
 0x1c5   : > { %860 = vrot.lane.b32.xlu0 %v855_v30, %s1841_s16  ;;  %888 = vrot.lane.b32.xlu1 %v855_v30, %s1838_s27 }
 0x1c9   : > { %1214 = vrot.lane.b32.xlu0 %v855_v30, %s1842_s17  ;;  %869 = vrot.lane.b32.xlu1 %v855_v30, %s1840_s14 }
 0x1cd   : > { %1205 = vrot.lane.b32.xlu1 %v855_v30, %s1844_s10  ;;  %893 = vrot.lane.b32.xlu0 %v853_v34, %s1836_s29 }
 0x1d1   : > { %884 = vrot.lane.b32.xlu1 %v853_v34, %s1838_s27  ;;  %874 = vrot.lane.b32.xlu0 %v853_v34, %s1839_s11 }
 0x1d5   : > { %865 = vrot.lane.b32.xlu1 %v853_v34, %s1840_s14  ;;  %856 = vrot.lane.b32.xlu0 %v853_v34, %s1841_s16 }
 0x1d9   : > { %1210 = vrot.lane.b32.xlu1 %v853_v34, %s1842_s17  ;;  %1201 = vrot.lane.b32.xlu0 %v853_v34, %s1844_s10 }
 0x1dd   : > { %895 = vrot.lane.b32.xlu1 %v854_v39, %s1836_s29  ;;  %886 = vrot.lane.b32.xlu0 %v854_v39, %s1838_s27  ;;  %s1598_s29 = smul.u32 384, %s1903_s25  ;;  %s296_s27 = scalar_lea.vmem [#allocation8], %s1597_s20 }
 0x1de   : > { %s1846_s25 = smov [#allocation8]  }
 0x1df   : > { %s1764_s20 = sshll.u32 %s1846_s25, 4  ;;  %s1765_s20 = int_to_ptr.vmem [resolvable:$false] %s1764_s20 }
 0x1e1   : > { %876 = vrot.lane.b32.xlu1 %v854_v39, %s1839_s11  ;;  %867 = vrot.lane.b32.xlu0 %v854_v39, %s1840_s14  ;;  %s1401_s11 = sshll.u32 %s296_s27, 4  ;;  %s1402_s11 = int_to_ptr.vmem [resolvable:$true] %s1401_s11 }
 0x1e2   : > { %s1760_s13 = scalar_lea.vmem %s1402_s11, 384  ;;  %p1767_p6 = scmp.lt.s32.totalorder %s1402_s11, %s1765_s20 }
 0x1e3   : > { %p1761_p11 = scmp.ne.s32.totalorder %s1402_s11, %s1760_s13 }
 0x1e5   : > { %858 = vrot.lane.b32.xlu1 %v854_v39, %s1841_s16  ;;  %1203 = vrot.lane.b32.xlu0 %v854_v39, %s1844_s10  ;;  %p1762_p1 = pnand %p1761_p11, %p2362_p0  ;;  %s1766_s10 = scalar_lea.vmem %s1765_s20, 768 }
 0x1e6   : > { %p1768_p12 = scmp.lt.s32.totalorder %s1766_s10, %s1760_s13 }
 0x1e7   : > { %p1763_p2 = pneg %p1762_p1 }
 0x1e8   : > { %p1769_p7 = por %p1768_p12, %p1767_p6 }
 0x1e9   : > { %1212 = vrot.lane.b32.xlu1 %v854_v39, %s1842_s17  ;;  %1196 = vrot.lane.b32.xlu0 %v855_v30, %s1845_s9  ;;  %v1220_v30 = vld [vmem:[#allocation7 + $0x10] sm:$0xff]  ;;  %s1399_s17 = scalar_lea.hbm %s2344_s6, %s1598_s29 }
 0x1ea   : > { %p1770_p9 = pnand %p1769_p7, %p1763_p2 }
 0x1ed   : > { %1194 = vrot.lane.b32.xlu1 %v854_v39, %s1845_s9  ;;  %1371 = vperm.xlu0 %1679, %v1368_v40  }
 0x1f1   : > { %1192 = vrot.lane.b32.xlu1 %v853_v34, %s1845_s9 }
 0x233   : > { %v879_v41 = vpop.permute.xlu0 %878  ;;  %v898_v42 = vpop.permute.xlu1 %897 }
 0x237   : > { %v861_v43 = vpop.permute.xlu0 %860  ;;  %v889_v44 = vpop.permute.xlu1 %888 }
 0x23b   : > { %v2210_v45 = vpop.permute.xlu0 %1214  ;;  %v870_v46 = vpop.permute.xlu1 %869 }
 0x23f   : > { %v2212_v47 = vpop.permute.xlu1 %1205  ;;  %v894_v48 = vpop.permute.xlu0 %893 }
 0x240   : > { %v901_v49 = vsel %vm351_vm2, %v898_v42, %v894_v48 }
 0x241   : > { %1569 = vmatpush3.msra.mxu1 %v901_v49 }
 0x242   : > { %1570 = vmatprep.subr.mxu1 %v1835_v0 }
 0x243   : > { %v885_v50 = vpop.permute.xlu1 %884  ;;  %1571 = vmatpush3.msk.msra.mxu1 %vm852_vm11, %v836_v28  ;;  %v875_v51 = vpop.permute.xlu0 %874 }
 0x244   : > { %1572 = vmatprep.subr.mxu1 %v1835_v0  ;;  %v892_v5 = vsel %vm341_vm3, %v889_v44, %v885_v50  ;;  %v882_v12 = vsel %vm330_vm5, %v879_v41, %v875_v51 }
 0x247   : > { %v866_v52 = vpop.permute.xlu1 %865  ;;  %v857_v53 = vpop.permute.xlu0 %856 }
 0x248   : > { %v873_v15 = vsel %vm320_vm6, %v870_v46, %v866_v52  ;;  %v864_v19 = vsel %vm310_vm7, %v861_v43, %v857_v53 }
 0x24b   : > { %v1211_v54 = vpop.permute.xlu1 %1210  ;;  %v2220_v55 = vpop.permute.xlu0 %1201 }
 0x24c   : > { %v1218_v20 = vsel %vm672_vm8, %v2210_v45, %v1211_v54  ;;  %v1209_v23 = vsel %vm662_vm9, %v2212_v47, %v2220_v55 }
 0x24f   : > { %v896_v56 = vpop.permute.xlu1 %895  ;;  %v887_v57 = vpop.permute.xlu0 %886 }
 0x250   : > { %v900_v58 = vsel %vm351_vm2, %v894_v48, %v896_v56  ;;  %v890_v59 = vsel %vm341_vm3, %v887_v57, %v889_v44  ;;  %v899_v14 = vsel %vm351_vm2, %v896_v56, %v898_v42  ;;  %v891_v4 = vsel %vm341_vm3, %v885_v50, %v887_v57 }
 0x251   : > { %933 = vmatprep.subr.mxu0 %v899_v14  ;;  %1573 = vmatpush3.msra.mxu1 %v890_v59 }
 0x252   : > { %934 = vmatpush1.msra.mxu0 %v900_v58  ;;  %1577 = vmatprep.subr.mxu1 %v1835_v0 }
 0x253   : > { %v877_v61 = vpop.permute.xlu1 %876  ;;  %1505 = vmatprep.subr.msk.mxu0 %vm851_vm13, %v835_v38  ;;  %v868_v62 = vpop.permute.xlu0 %867  ;;  %1575 = vmatmul.mubr.msk.f32.vlgmr.msra.gmra.mxu1 %vm357_vm4, %v903_v60 }
 0x254   : > { %v880_v63 = vsel %vm330_vm5, %v877_v61, %v879_v41  ;;  %1506 = vmatpush1.msk.msra.mxu0 %vm850_vm12, %v834_v32  ;;  %v871_v13 = vsel %vm320_vm6, %v868_v62, %v870_v46  ;;  %v881_v6 = vsel %vm330_vm5, %v875_v51, %v877_v61  ;;  %v872_v10 = vsel %vm320_vm6, %v866_v52, %v868_v62 }
 0x255   : > { %937 = vmatprep.subr.mxu0 %v891_v4  ;;  %1578 = vmatpush3.msra.mxu1 %v880_v63 }
 0x256   : > { %938 = vmatpush1.msra.mxu0 %v892_v5  ;;  %1579 = vmatprep.subr.mxu1 %v1835_v0 }
 0x257   : > { %v859_v7 = vpop.permute.xlu1 %858  ;;  %1077 = vmatprep.subr.mxu0 %v881_v6  ;;  %1580 = vmatpush3.msra.mxu1 %v871_v13  ;;  %v1204_v9 = vpop.permute.xlu0 %1203 }
 0x258   : > { %v862_v8 = vsel %vm310_vm7, %v859_v7, %v861_v43  ;;  %1507 = vmatmul.mubr.msk.f32.vlgmr.msra.gmra.mxu0 %vm357_vm4, %v903_v60  ;;  %1581 = vmatprep.subr.mxu1 %v1835_v0  ;;  %v863_v18 = vsel %vm310_vm7, %v857_v53, %v859_v7  ;;  %v1207_v26 = vsel %vm662_vm9, %v1204_v9, %v2212_v47 }
 0x259   : > { %1078 = vmatpush1.msra.mxu0 %v882_v12  ;;  %1582 = vmatpush3.msra.mxu1 %v862_v8  ;;  %v1208_v28 = vsel %vm662_vm9, %v2220_v55, %v1204_v9 }
 0x25a   : > { %1079 = vmatprep.subr.mxu0 %v872_v10  ;;  %1583 = vmatprep.mubr.msk.f32.mxu1 %vm1837_vm0, %v1835_v0 }
 0x25b   : > { %1080 = vmatpush1.msra.mxu0 %v873_v15  ;;  %1586 = vmatprep.subr.mxu1 %v1835_v0  ;;  %v1213_v17 = vpop.permute.xlu1 %1212  ;;  %v1197_v24 = vpop.permute.xlu0 %1196 }
 0x25c   : > { %1081 = vmatprep.subr.mxu0 %v863_v18  ;;  %1584 = vmatmul.mubr.msk.f32.vlgmr.msra.gmra.mxu1 %vm357_vm4, %v883_v11  ;;  %v1216_v21 = vsel %vm672_vm8, %v1213_v17, %v2210_v45  ;;  %v1217_v22 = vsel %vm672_vm8, %v1211_v54, %v1213_v17 }
 0x25d   : > { %1587 = vmatpush3.msra.mxu1 %v1218_v20  ;;  %1082 = vmatpush1.msra.mxu0 %v864_v19 }
 0x25e   : > { %1115 = vmatprep.mubr.f32.mxu0 %v1835_v0  ;;  %1588 = vmatprep.subr.mxu1 %v1835_v0 }
 0x25f   : > { %1510 = vmatmul.mubr.msk.f32.vlgmr.msra.gmra.mxu0 %vm357_vm4, %v883_v11  ;;  %1250 = vmatprep.subr.mxu0 %v1216_v21  ;;  %v1195_v25 = vpop.permute.xlu1 %1194 }
 0x260   : > { %1589 = vmatpush3.msra.mxu1 %v1209_v23  ;;  %1251 = vmatpush1.msra.mxu0 %v1217_v22  ;;  %v1198_v27 = vsel %vm652_vm10, %v1195_v25, %v1197_v24 }
 0x261   : > { %1252 = vmatprep.subr.mxu0 %v1207_v26  ;;  %1590 = vmatprep.subr.mxu1 %v1835_v0 }
 0x262   : > { %1253 = vmatpush1.msra.mxu0 %v1208_v28  ;;  %1288 = vmatprep.mubr.f32.mxu0 %v1835_v0 }
 0x263   : > { %1254 = vmatprep.subr.mxu0 %v1198_v27  ;;  %v1193_v29 = vpop.permute.xlu1 %1192  ;;  %1592 = vmatprep.mubr.msk.f32.mxu1 %vm1837_vm0, %v1835_v0 }
 0x264   : > { %v1199_v31 = vsel %vm652_vm10, %v1193_v29, %v1195_v25  ;;  %v1200_v32 = vsel %vm652_vm10, %v1197_v24, %v1193_v29 }
 0x265   : > { %1255 = vmatpush1.msra.mxu0 %v1199_v31  ;;  %1591 = vmatpush3.msra.mxu1 %v1200_v32 }
 0x266   : > { %1512 = vmatmul.mubr.msk.f32.vlgmr.msra.gmra.mxu0 %vm357_vm4, %v1220_v30  ;;  %1593 = vmatmul.mubr.msk.f32.vlgmr.msra.gmra.mxu1 %vm357_vm4, %v1220_v30 }
 0x268   : > { %v1372_v43 = vpop.permute.xlu0 %1371 }
 0x313   : > { %v1044_v33 = vpop.f32.mrf.mxu1 }
 0x315   : > { %v1576_v34 = vpop.f32.mrf.mxu1 }
 0x318   : > { %v973_v35 = vpop.f32.mrf.mxu0 }
 0x31a   : > { %v975_v36 = vpop.f32.mrf.mxu0 }
 0x31c   : > { %v1188_v37 = vpop.f32.mrf.mxu1 }
 0x31d   : > { %v1189_v41 = vadd.f32 %v1188_v37, %v1044_v33 }
 0x31e   : > { %v1585_v38 = vpop.f32.mrf.mxu1 }
 0x31f   : > { %v1117_v0 = vpop.f32.mrf.mxu0 }
 0x320   : > { %v1118_v40 = vadd.f32 %v1117_v0, %v973_v35 }
 0x321   : > { %v1119_v39 = vpop.f32.mrf.mxu0 }
 0x322   : > { %v1120_v44 = vadd.f32 %v1119_v39, %v975_v36 }
 0x326   : > { %v1290_v16 = vpop.f32.mrf.mxu0  ;;  %v1361_v42 = vpop.f32.mrf.mxu1 }
 0x327   : > { %v1365_v45 = vadd.f32 %v1290_v16, %v1118_v40  ;;  %v1367_v46 = vadd.f32 %v1361_v42, %v1189_v41 }
 0x328   : > { %v1292_v47 = vpop.f32.mrf.mxu0  ;;  %v1594_v48 = vpop.f32.mrf.mxu1 }
 0x329   : > { %v1374_v49 = vadd.f32 %v1372_v43, %v1365_v45  ;;  %v1376_v50 = vadd.f32 %v1372_v43, %v1367_v46  ;;  %v1366_v51 = vadd.f32 %v1292_v47, %v1120_v44 }
 0x32b   : > { %v1377_v52 = vadd.f32 %v1374_v49, %v2018_v2  ;;  %v1379_v53 = vadd.f32 %v1376_v50, %v2024_v3  ;;  %v1375_v54 = vadd.f32 %v1372_v43, %v1366_v51 }
 0x32d   : > { %v1380_v55 = vmax.f32 %v1377_v52, 0.0  ;;  %v1382_v56 = vmax.f32 %v1379_v53, 0.0  ;;  %v1378_v57 = vadd.f32 %v1375_v54, %v2016_v1 }
 0x32f   : > { %1383 = vst [vmem:[%s296_s27] sm:$0xff] %v1380_v55  ;;  %1385 = vst [vmem:[%s296_s27 + $0x10] sm:$0xff] %v1382_v56  ;;  %v1381_v58 = vmax.f32 %v1378_v57, 0.0 }
 0x331   : > { %1384 = vst [vmem:[%s296_s27 + $0x8] sm:$0xff] %v1381_v58 }
 0x332   : > { %1773 = shalt.err (!%p1770_p9)
}
 0x333   : > { %s1774_s9 = scalar_lea.hbm %s1399_s17, 384  ;;  %s1778_s15 = scalar_lea.hbm %s2344_s6, 768 }
 0x334   : > { %p1775_p13 = scmp.ne.s32.totalorder %s1399_s17, %s1774_s9  ;;  %p1779_p4 = scmp.lt.s32.totalorder %s1399_s17, %s2344_s6 }
 0x335   : > { %p1780_p8 = scmp.lt.s32.totalorder %s1778_s15, %s1774_s9 }
 0x336   : > { %p1776_p5 = pnand %p1775_p13, %p2362_p0 }
 0x337   : > { %p1781_p3 = por %p1780_p8, %p1779_p4 }
 0x338   : > { %p1777_p10 = pneg %p1776_p5 }
 0x33a   : > { %p1782_p11 = pnand %p1781_p3, %p1777_p10 }
 0x33c   : > { %1785 = shalt.err (!%p1782_p11)
}
 0x33d   : > { %1609 = dma.vmem_to_hbm [thread:$0]  (%p2362_p0), %s1402_s11, 384, %s1399_s17, %s1387_s12  }
 0x33e PF: > { %s1413_s29 = sand.u32 1, %s1816_s21   ;;  %p2363_p1 = scmp.ne.s32.totalorder %s2351_s28, 0 }
 0x33f   : > { %p2364_p2 = scmp.ge.s32.totalorder %s1828_s24, 2  ;;  %s1414_s27 = scalar_lea.sflag [#allocation4], %s1413_s29 }
 0x341   : > { %p1623_p6 = pnand %p2364_p2, %p2363_p1 }
 0x343   : > { %p1624_p12 = pneg %p1623_p6 }
 0x345   : > { %1811 = dma.done.wait (%p1624_p12), %s1414_s27, 384  }
 0x346   : > { %1813 = vsyncadd (%p1624_p12), %s1414_s27, 4294966912  ;;  %p20_p7 = scmp.ge.s32.totalorder %s1954_s19, 4   ;;  %s2365_s21 = smov %s1820_s22 }
 0x347   : > { %s2366_s22 = smov %s1824_s23  ;;  %s2367_s23 = smov %s1970_s7 }
 0x348   : > { %s2368_s24 = smov %s1954_s19  ;;  %22 = sbr.rel (!%p20_p7) target bundleno = 8 (0x8), region = 101 }
 0x34d   :  { %1419 = vsyncpa [#allocation3], 1 }
 0x34e   :  { %1421 = vsyncpa [#allocation3 + $0x1], 1 }
 0x34f   :  { %1422 = vsyncpa [#allocation6], 1 }
 0x350   :  { %1423 = vsyncpa [#allocation4], 1 }
 0x351   :  { %1425 = vsyncpa [#allocation4 + $0x1], 1 }

</bundles_post_ra>
